<compile_context>
chip_gen: v6e
topology: v6e:2x2x1
jax: 0.10.0
libtpu: 0.0.40
codegen_flags: <defaults>
</compile_context>

<pallas_src>
import jax
import jax.numpy as jnp
from jax.experimental import pallas as pl
from jax.experimental.pallas import tpu as pltpu

# ---- model hyper-params (small, consistent with the module's __init__) ----
B = 2             # batch
R = 8             # number of visual regions
DIM_V = 32        # opt['dim_v']
DIM_H = 32        # opt['vas']['dim_h']
G = 2             # opt['attention']['nb_glimpses']
NUM_CLASSES = 16  # len(vocab_answers)


def att_kernel(v_ref, w_att_ref, b_att_ref, w_fuse_ref, b_fuse_ref,
               w_cls_ref, b_cls_ref, y_ref):
    Bv, Rv, Dv = v_ref.shape
    Gv = w_att_ref.shape[1]

    v = v_ref[...]                                                  # [B, R, D]

    # --- attention scores: one MXU push for the whole batch ---
    v2 = v.reshape(Bv * Rv, Dv)                                     # [B*R, D]
    scores = jnp.dot(v2, w_att_ref[...],
                     preferred_element_type=jnp.float32) + b_att_ref[...]   # [B*R, G]
    scores = scores.reshape(Bv, Rv, Gv)                             # [B, R, G]

    # --- softmax over regions (axis=1); divide moved to EUP reciprocal ---
    m = jnp.max(scores, axis=1, keepdims=True)                      # [B, 1, G]
    e = jnp.exp(scores - m)
    denom = jnp.sum(e, axis=1, keepdims=True)                       # [B, 1, G]
    alpha = e * pl.reciprocal(denom, approx=True)                   # [B, R, G]

    # --- attention-weighted sum of region features (no explicit alpha.T) ---
    v_att = jnp.einsum('brg,brd->bgd', alpha, v,
                       preferred_element_type=jnp.float32)          # [B, G, D]

    # --- all per-glimpse fusion linears as ONE block-diagonal matmul + tanh ---
    h = jnp.tanh(
        jnp.dot(v_att.reshape(Bv, Gv * Dv), w_fuse_ref[...],
                preferred_element_type=jnp.float32) + b_fuse_ref[...])      # [B, G*H]

    # --- answer_sampler: Linear(G*dim_h -> padded num_classes), lane-dense ---
    y_ref[...] = jnp.dot(h, w_cls_ref[...],
                         preferred_element_type=jnp.float32) + b_cls_ref[...]


def att_forward(v, w_att, b_att, w_fuse, b_fuse, w_cls, b_cls):
    Bv, Rv, Dv = v.shape
    Gv, _, Hv = w_fuse.shape
    C = w_cls.shape[1]

    # ---- one-time parameter preprocessing (would be cached at model load) ----
    # Block-diagonal fusion weight: rows ordered (g, d), cols ordered (g, h),
    # so [B, G*D] @ W_blk == concat_g( v_att[:, g, :] @ W_g ).
    eye = jnp.eye(Gv, dtype=w_fuse.dtype)
    w_fuse_blk = jnp.einsum('gdh,gk->gdkh', w_fuse, eye).reshape(Gv * Dv, Gv * Hv)
    b_fuse_flat = b_fuse.reshape(1, Gv * Hv)

    # Lane-dense classifier: pad output columns to a multiple of 128.
    c_pad = ((C + 127) // 128) * 128
    w_cls_p = jnp.zeros((Gv * Hv, c_pad), w_cls.dtype).at[:, :C].set(w_cls)
    b_cls_p = jnp.zeros((1, c_pad), b_cls.dtype).at[:, :C].set(b_cls.reshape(1, C))

    vmem_spec = pl.BlockSpec(memory_space=pltpu.MemorySpace.VMEM)
    y_pad = pl.pallas_call(
        att_kernel,
        out_shape=jax.ShapeDtypeStruct((Bv, c_pad), jnp.float32),
        in_specs=[vmem_spec] * 7,
        out_specs=vmem_spec,
    )(v, w_att, b_att, w_fuse_blk, b_fuse_flat, w_cls_p, b_cls_p)
    return y_pad[:, :C]


def reference_forward(v, w_att, b_att, w_fuse, b_fuse, w_cls, b_cls):
    # pure-JAX reference for correctness check
    scores = jnp.einsum('brd,dg->brg', v, w_att) + b_att            # [B,R,G]
    alpha = jax.nn.softmax(scores, axis=1)
    v_att = jnp.einsum('brg,brd->bgd', alpha, v)                    # [B,G,D]
    h = jnp.tanh(jnp.einsum('bgd,gdh->bgh', v_att, w_fuse) + b_fuse)  # [B,G,H]
    h = h.reshape(v.shape[0], -1)                                   # concat along dim 1
    return h @ w_cls + b_cls


if __name__ == "__main__":
    key = jax.random.PRNGKey(0)
    k_v, k_wa, k_ba, k_wf, k_bf, k_wc, k_bc = jax.random.split(key, 7)

    input_v = jax.random.normal(k_v, (B, R, DIM_V), dtype=jnp.float32)

    # deterministic synthetic parameters (shapes follow the module's __init__)
    w_att = jax.random.normal(k_wa, (DIM_V, G), dtype=jnp.float32) * 0.1
    b_att = jax.random.normal(k_ba, (1, G), dtype=jnp.float32) * 0.1
    w_fuse = jax.random.normal(k_wf, (G, DIM_V, DIM_H), dtype=jnp.float32) * 0.1
    b_fuse = jax.random.normal(k_bf, (G, DIM_H), dtype=jnp.float32) * 0.1
    w_cls = jax.random.normal(k_wc, (G * DIM_H, NUM_CLASSES), dtype=jnp.float32) * 0.1
    b_cls = jax.random.normal(k_bc, (1, NUM_CLASSES), dtype=jnp.float32) * 0.1

    y = att_forward(input_v, w_att, b_att, w_fuse, b_fuse, w_cls, b_cls)
    y = jax.block_until_ready(y)

    y_ref = reference_forward(input_v, w_att, b_att, w_fuse, b_fuse, w_cls, b_cls)
    assert y.shape == (B, NUM_CLASSES)
    # tolerance slightly loosened because the softmax denominator uses the
    # approximate EUP reciprocal (pl.reciprocal(approx=True)).
    assert jnp.allclose(y, y_ref, rtol=2e-3, atol=2e-3), "mismatch vs JAX reference"

    print("KERNEL_OK")
</pallas_src>

<mosaic_0001>
module attributes {stable_mosaic.version = 11 : i64} {
  func.func @att_kernel(%arg0: memref<2x8x32xf32, #tpu.memory_space<vmem>>, %arg1: memref<32x2xf32, #tpu.memory_space<vmem>>, %arg2: memref<1x2xf32, #tpu.memory_space<vmem>>, %arg3: memref<64x64xf32, #tpu.memory_space<vmem>>, %arg4: memref<1x64xf32, #tpu.memory_space<vmem>>, %arg5: memref<64x128xf32, #tpu.memory_space<vmem>>, %arg6: memref<1x128xf32, #tpu.memory_space<vmem>>, %arg7: memref<2x128xf32, #tpu.memory_space<vmem>>) attributes {dimension_semantics = [], scalar_prefetch = 0 : i64, scratch_operands = 0 : i64, tpu.core_type = #tpu.core_type<tc>} {
    %c0 = arith.constant 0 : index
    %c0_0 = arith.constant 0 : index
    %c0_1 = arith.constant 0 : index
    %0 = vector.load %arg0[%c0, %c0_0, %c0_1] : memref<2x8x32xf32, #tpu.memory_space<vmem>>, vector<2x8x32xf32>
    %1 = vector.shape_cast %0 : vector<2x8x32xf32> to vector<16x32xf32>
    %c0_2 = arith.constant 0 : index
    %c0_3 = arith.constant 0 : index
    %2 = vector.load %arg1[%c0_2, %c0_3] : memref<32x2xf32, #tpu.memory_space<vmem>>, vector<32x2xf32>
    %cst = arith.constant dense<0.000000e+00> : vector<16x2xf32>
    %3 = tpu.matmul %1, %2, %cst {dimension_numbers = #tpu.dot_dimension_numbers<[1], [0], [0], [1], [0, 0, 1, 1], [], []>} : vector<16x32xf32>, vector<32x2xf32>, vector<16x2xf32> -> vector<16x2xf32>
    %c0_4 = arith.constant 0 : index
    %c0_5 = arith.constant 0 : index
    %4 = vector.load %arg2[%c0_4, %c0_5] : memref<1x2xf32, #tpu.memory_space<vmem>>, vector<1x2xf32>
    %5 = vector.broadcast %4 : vector<1x2xf32> to vector<16x2xf32>
    %6 = arith.addf %3, %5 : vector<16x2xf32>
    %7 = vector.shape_cast %6 : vector<16x2xf32> to vector<2x8x2xf32>
    %cst_6 = arith.constant dense<0xFF800000> : vector<2x2xf32>
    %8 = vector.multi_reduction <maximumf>, %7, %cst_6 [1] : vector<2x8x2xf32> to vector<2x2xf32>
    %9 = vector.shape_cast %8 : vector<2x2xf32> to vector<2x1x2xf32>
    %10 = vector.broadcast %9 : vector<2x1x2xf32> to vector<2x8x2xf32>
    %11 = arith.subf %7, %10 : vector<2x8x2xf32>
    %12 = math.exp %11 : vector<2x8x2xf32>
    %cst_7 = arith.constant dense<0.000000e+00> : vector<2x2xf32>
    %13 = vector.multi_reduction <add>, %12, %cst_7 [1] : vector<2x8x2xf32> to vector<2x2xf32>
    %14 = vector.shape_cast %13 : vector<2x2xf32> to vector<2x1x2xf32>
    %15 = tpu.reciprocal %14 {approx = true} : vector<2x1x2xf32> -> vector<2x1x2xf32>
    %16 = vector.broadcast %15 : vector<2x1x2xf32> to vector<2x8x2xf32>
    %17 = arith.mulf %12, %16 : vector<2x8x2xf32>
    "tpu.trace_start"() <{level = 10 : i32, message = "brg,brd->bgd"}> : () -> ()
    %cst_8 = arith.constant dense<0.000000e+00> : vector<2x2x32xf32>
    %18 = tpu.matmul %17, %0, %cst_8 {dimension_numbers = #tpu.dot_dimension_numbers<[1], [1], [2], [2], [0, 0, 0, 2, 1, 2], [0], [0]>} : vector<2x8x2xf32>, vector<2x8x32xf32>, vector<2x2x32xf32> -> vector<2x2x32xf32>
    "tpu.trace_stop"() : () -> ()
    %19 = vector.shape_cast %18 : vector<2x2x32xf32> to vector<2x64xf32>
    %c0_9 = arith.constant 0 : index
    %c0_10 = arith.constant 0 : index
    %20 = vector.load %arg3[%c0_9, %c0_10] : memref<64x64xf32, #tpu.memory_space<vmem>>, vector<64x64xf32>
    %cst_11 = arith.constant dense<0.000000e+00> : vector<2x64xf32>
    %21 = tpu.matmul %19, %20, %cst_11 {dimension_numbers = #tpu.dot_dimension_numbers<[1], [0], [0], [1], [0, 0, 1, 1], [], []>} : vector<2x64xf32>, vector<64x64xf32>, vector<2x64xf32> -> vector<2x64xf32>
    %c0_12 = arith.constant 0 : index
    %c0_13 = arith.constant 0 : index
    %22 = vector.load %arg4[%c0_12, %c0_13] : memref<1x64xf32, #tpu.memory_space<vmem>>, vector<1x64xf32>
    %23 = vector.broadcast %22 : vector<1x64xf32> to vector<2x64xf32>
    %24 = arith.addf %21, %23 : vector<2x64xf32>
    %25 = math.tanh %24 : vector<2x64xf32>
    %c0_14 = arith.constant 0 : index
    %c0_15 = arith.constant 0 : index
    %26 = vector.load %arg5[%c0_14, %c0_15] : memref<64x128xf32, #tpu.memory_space<vmem>>, vector<64x128xf32>
    %cst_16 = arith.constant dense<0.000000e+00> : vector<2x128xf32>
    %27 = tpu.matmul %25, %26, %cst_16 {dimension_numbers = #tpu.dot_dimension_numbers<[1], [0], [0], [1], [0, 0, 1, 1], [], []>} : vector<2x64xf32>, vector<64x128xf32>, vector<2x128xf32> -> vector<2x128xf32>
    %c0_17 = arith.constant 0 : index
    %c0_18 = arith.constant 0 : index
    %28 = vector.load %arg6[%c0_17, %c0_18] : memref<1x128xf32, #tpu.memory_space<vmem>>, vector<1x128xf32>
    %29 = vector.broadcast %28 : vector<1x128xf32> to vector<2x128xf32>
    %30 = arith.addf %27, %29 : vector<2x128xf32>
    %c0_19 = arith.constant 0 : index
    %c0_20 = arith.constant 0 : index
    %31 = vector.load %arg7[%c0_19, %c0_20] : memref<2x128xf32, #tpu.memory_space<vmem>>, vector<2x128xf32>
    tpu.vector_store %arg7[%c0_19, %c0_20], %30 {strides = array<i32>} : memref<2x128xf32, #tpu.memory_space<vmem>>, vector<2x128xf32>,
    return
  }
}

</mosaic_0001>

<bundles_post_ra>
// kernel: tpu_custom_call.1
= control target key start
LH: loop header
LB: loop body
LE: loop exit
PB: predicated region body
PF: predicated region fallthrough
CT: control target
= control target key end

     0   :  { %12 = vsyncpa [#allocation3], 0  ;;  %s915_s0 = inlined_call_operand.vmem [shape: f32[2,8,32], index: 0, kind: input, shape index: {}]   ;;  %s916_s1 = inlined_call_operand.vmem [shape: f32[32,2], index: 1, kind: input, shape index: {}]   ;;  %s917_s2 = inlined_call_operand.vmem [shape: f32[1,2], index: 2, kind: input, shape index: {}]   ;;  %s918_s3 = inlined_call_operand.hbm [shape: f32[64,64], index: 3, kind: input, shape index: {}]   ;;  %s919_s4 = inlined_call_operand.vmem [shape: f32[1,64], index: 4, kind: input, shape index: {}]   ;;  %s920_s5 = inlined_call_operand.hbm [shape: f32[64,128], index: 5, kind: input, shape index: {}]   ;;  %s921_s6 = inlined_call_operand.vmem [shape: f32[1,128], index: 6, kind: input, shape index: {}]   ;;  %s922_s7 = inlined_call_operand.hbm [shape: f32[2,128], index: 7, kind: output, shape index: {}]  }
   0x1   :  { %13 = vsyncpa [#allocation6], 0 }
   0x2   :  { %14 = vsyncpa [#allocation4], 0  ;;  %s790_s24 = smov [#allocation2]  }
   0x3   :  { %s26_s25 = sshll.u32 %s790_s24, 4  ;;  %s27_s25 = int_to_ptr.vmem [resolvable:$true] %s26_s25 }
   0x4   :  { %s732_s26 = scalar_lea.vmem %s27_s25, 1024  ;;  %p737_p1 = scmp.lt.s32.totalorder %s27_s25, %s27_s25 }
   0x5   :  { %p733_p0 = scmp.ne.s32.totalorder %s27_s25, %s732_s26  ;;  %p738_p2 = scmp.lt.s32.totalorder %s732_s26, %s732_s26 }
   0x7   :  { %p739_p3 = por %p738_p2, %p737_p1 }
   0x9   :  { %p740_p4 = pnand %p739_p3, %p733_p0 }
   0xb   :  { %743 = shalt.err (!%p740_p4)
}
   0xc   :  { %s791_s27 = smov 128   ;;  %s792_s28 = smov 8  }
   0xd   :  { %32 = dma.hbm_to_vmem [thread:$0]  %s918_s3, 1024, %s27_s25, [#allocation3], %s791_s27, %s791_s27, %s792_s28  }
   0xe   :  { %s793_s8 = smov [#allocation5]  }
   0xf   :  { %s40_s9 = sshll.u32 %s793_s8, 4  ;;  %s41_s9 = int_to_ptr.vmem [resolvable:$true] %s40_s9 }
  0x10   :  { %s752_s10 = scalar_lea.vmem %s41_s9, 1024  ;;  %p757_p6 = scmp.lt.s32.totalorder %s41_s9, %s41_s9 }
  0x11   :  { %p753_p5 = scmp.ne.s32.totalorder %s41_s9, %s752_s10  ;;  %p758_p7 = scmp.lt.s32.totalorder %s752_s10, %s752_s10 }
  0x13   :  { %p759_p8 = por %p758_p7, %p757_p6 }
  0x15   :  { %p760_p9 = pnand %p759_p8, %p753_p5 }
  0x17   :  { %763 = shalt.err (!%p760_p9)
}
  0x18   :  { %46 = dma.hbm_to_vmem [thread:$0]  %s920_s5, 1024, %s41_s9, [#allocation6], %s791_s27, %s791_s27, %s792_s28  }
  0x19   :  { %784 = dma.done.wait [#allocation3], 1024  }
  0x1a   :  { %785 = vsyncadd [#allocation3], 4294966272 }
  0x1b   :  { %786 = dma.done.wait [#allocation6], 1024  }
  0x1c   :  { %787 = vsyncadd [#allocation6], 4294966272  ;;  %vm68_vm0 = vcmask 261120   ;;  %v60_v0 = vld [vmem:[%s916_s1 + $0x18] sm:$0xff]  ;;  %v59_v1 = vld [vmem:[%s916_s1 + $0x10] sm:$0xff]  ;;  %v794_v6 = vmov 0.0   ;;  %v404_v61 = vlaneseq }
  0x1d   :  { %646 = vmatprep.subr.mxu0 %v60_v0  ;;  %v55_v2 = vld [vmem:[%s915_s0] sm:$0xff]  ;;  %v58_v3 = vld [vmem:[%s916_s1 + $0x8] sm:$0xff]  ;;  %657 = vmatprep.subr.mxu1 %v794_v6  ;;  %vm795_vm1 = vmmov 0   ;;  %vm150_vm2 = vcmask 15360   ;;  %vm221_vm3 = vcmask 64512   ;;  %v421_v52 = vld [vmem:[#allocation2 + $0x38] sm:$0xff] }
  0x1e   :  { %647 = vmatpush3.msra.mxu0 %v60_v0  ;;  %654 = vmatprep.mubr.msk.f32.mxu0 %vm68_vm0, %v55_v2  ;;  %v57_v4 = vld [vmem:[%s916_s1] sm:$0xff]  ;;  %v864_v5 = vld [vmem:[%s915_s0 + $0x8] sm:$0xff]  ;;  %v420_v53 = vld [vmem:[#allocation2 + $0x30] sm:$0xff]  ;;  %v796_v59 = vmov 1934713408   ;;  %v405_v0 = vshrl.u32 %v404_v61, 7 }
  0x1f   :  { %648 = vmatprep.subr.mxu0 %v59_v1  ;;  %659 = vmatprep.mubr.msk.f32.mxu1 %vm795_vm1, %v794_v6  ;;  %v609_v7 = vld [vmem:[%s917_s2] ss:$0 sm:$0xff]  ;;  %v419_v54 = vld [vmem:[#allocation2 + $0x28] sm:$0xff]  ;;  %v417_v56 = vld [vmem:[#allocation2 + $0x18] sm:$0xff]  ;;  %v402_v60 = vunpack.c.l.s4 %v796_v59  ;;  %s797_s2 = smov 32   ;;  %vm429_vm4 = vcmask 523264  }
  0x20   :  { %649 = vmatpush3.msra.mxu0 %v59_v1  ;;  %658 = vmatpush3.msra.mxu1 %v55_v2  ;;  %v418_v55 = vld [vmem:[#allocation2 + $0x20] sm:$0xff]  ;;  %v416_v57 = vld [vmem:[#allocation2 + $0x10] sm:$0xff]  ;;  %v415_v58 = vld [vmem:[#allocation2 + $0x8] sm:$0xff]  ;;  %s798_s27 = smov [#allocation7]  }
  0x21   :  { %650 = vmatprep.subr.mxu0 %v58_v3  ;;  %662 = vmatprep.subr.mxu1 %v794_v6  ;;  %v414_v62 = vld [vmem:[#allocation2] sm:$0xff]  ;;  %v403_v63 = vunpack.c.0.s8 %v402_v60  ;;  %s599_s28 = sshll.u32 %s798_s27, 4  ;;  %s600_s28 = int_to_ptr.vmem [resolvable:$true] %s599_s28 }
  0x22   :  { %651 = vmatpush3.msra.mxu0 %v58_v3  ;;  %s764_s29 = scalar_lea.vmem %s600_s28, 32  ;;  %p769_p11 = scmp.lt.s32.totalorder %s600_s28, %s600_s28 }
  0x23   :  { %652 = vmatprep.subr.mxu0 %v57_v4  ;;  %v406_v3 = vsub.s32 %v403_v63, %v405_v0  ;;  %p765_p10 = scmp.ne.s32.totalorder %s600_s28, %s764_s29  ;;  %p770_p12 = scmp.lt.s32.totalorder %s764_s29, %s764_s29 }
  0x24   :  { %653 = vmatpush3.msra.mxu0 %v57_v4 }
  0x25   :  { %655 = vmatmul.mubr.msk.f32.vlgmr.msra.gmra.mxu0 %vm68_vm0, %v864_v5  ;;  %686 = vmatprep.subr.mxu0 %v794_v6  ;;  %p771_p13 = por %p770_p12, %p769_p11 }
  0x26   :  { %702 = vmatprep.mubr.msk.f32.mxu0 %vm795_vm1, %v794_v6 }
  0x27   :  { %p772_p0 = pnand %p771_p13, %p765_p10 }
  0xe5   :  { %v656_v8 = vpop.f32.mrf.mxu0 }
  0xe6   :  { %v147_v9 = vadd.f32 %v656_v8, %v609_v7 }
  0xe7   :  { %v141_v10 = vpop.f32.mrf.mxu0 }
  0xe8   :  { %v158_v11 = vsel %vm150_vm2, %v147_v9, -inf  ;;  %v142_v12 = vadd.f32 %v609_v7, %v141_v10 }
  0xe9   :  { %v159_v13 = vrot.slane %v158_v11, 4 }
  0xea   :  { %v151_v14 = vsel %vm150_vm2, %v142_v12, -inf }
  0xeb   :  { %v160_v15 = vmax.f32 %v158_v11, %v159_v13  ;;  %v152_v16 = vrot.slane %v151_v14, 4  ;;  %v510_v13 = vld [vmem:[#allocation5 + $0x30] sm:$0xff] }
  0xed   :  { %v161_v17 = vrot.slane %v160_v15, 2  ;;  %v153_v18 = vmax.f32 %v151_v14, %v152_v16  ;;  %v509_v14 = vld [vmem:[#allocation5 + $0x28] sm:$0xff]  ;;  %v507_v16 = vld [vmem:[#allocation5 + $0x18] sm:$0xff] }
  0xef   :  { %v162_v19 = vmax.f32 %v160_v15, %v161_v17  ;;  %v154_v20 = vrot.slane %v153_v18, 2  ;;  %v508_v15 = vld [vmem:[#allocation5 + $0x20] sm:$0xff]  ;;  %v506_v17 = vld [vmem:[#allocation5 + $0x10] sm:$0xff] }
  0xf1   :  { %v163_v21 = vrot.slane %v162_v19, 1  ;;  %v155_v22 = vmax.f32 %v153_v18, %v154_v20  ;;  %v505_v18 = vld [vmem:[#allocation5 + $0x8] sm:$0xff]  ;;  %v614_v20 = vld [vmem:[%s919_s4] ss:$0 sm:$0xff] }
  0xf3   :  { %v164_v23 = vmax.f32 %v162_v19, %v163_v21  ;;  %v156_v24 = vrot.slane %v155_v22, 1  ;;  %v504_v19 = vld [vmem:[#allocation5] sm:$0xff] }
  0xf5   :  { %v166_v25 = vsub.f32 %v147_v9, %v164_v23  ;;  %v157_v26 = vmax.f32 %v155_v22, %v156_v24 }
  0xf7   :  { %v169_v27 = vmul.f32 1.442695, %v166_v25  ;;  %v165_v28 = vsub.f32 %v142_v12, %v157_v26  ;;  %v511_v12 = vld [vmem:[#allocation5 + $0x38] sm:$0xff]  ;;  %v616_v25 = vld [vmem:[%s921_s6] ss:$0 sm:$0xff] }
  0xf8   :  { %687 = vmatpush3.msra.mxu0 %v511_v12 }
  0xf9   :  { %714 = vpow2.f32 %v169_v27  ;;  %v167_v29 = vmul.f32 1.442695, %v165_v28  ;;  %688 = vmatprep.subr.mxu0 %v794_v6 }
  0xfa   :  { %689 = vmatpush3.msra.mxu0 %v510_v13 }
  0xfb   :  { %716 = vpow2.f32 %v167_v29  ;;  %690 = vmatprep.subr.mxu0 %v794_v6 }
  0xfc   :  { %691 = vmatpush3.msra.mxu0 %v509_v14 }
  0xfd   :  { %692 = vmatprep.subr.mxu0 %v794_v6 }
  0xfe   :  { %693 = vmatpush3.msra.mxu0 %v508_v15 }
  0xff   :  { %694 = vmatprep.subr.mxu0 %v794_v6 }
 0x100   :  { %695 = vmatpush3.msra.mxu0 %v507_v16 }
 0x101   :  { %696 = vmatprep.subr.mxu0 %v794_v6 }
 0x102   :  { %697 = vmatpush3.msra.mxu0 %v506_v17 }
 0x103   :  { %698 = vmatprep.subr.mxu0 %v794_v6 }
 0x104   :  { %699 = vmatpush3.msra.mxu0 %v505_v18 }
 0x105   :  { %700 = vmatprep.subr.mxu0 %v794_v6 }
 0x106   :  { %v715_v30 = vpop.eup %714  ;;  %701 = vmatpush3.msra.mxu0 %v504_v19 }
 0x107   :  { %v178_v31 = vsel %vm150_vm2, %v715_v30, 0.0 }
 0x108   :  { %v717_v32 = vpop.eup %716  ;;  %v179_v33 = vrot.slane %v178_v31, 4 }
 0x109   :  { %v171_v34 = vsel %vm150_vm2, %v717_v32, 0.0 }
 0x10a   :  { %v180_v35 = vadd.f32 %v179_v33, %v178_v31  ;;  %v172_v36 = vrot.slane %v171_v34, 4 }
 0x10c   :  { %v181_v37 = vrot.slane %v180_v35, 2  ;;  %v173_v38 = vadd.f32 %v172_v36, %v171_v34 }
 0x10e   :  { %v182_v39 = vadd.f32 %v181_v37, %v180_v35  ;;  %v174_v40 = vrot.slane %v173_v38, 2 }
 0x110   :  { %v183_v41 = vrot.slane %v182_v39, 1  ;;  %v175_v42 = vadd.f32 %v174_v40, %v173_v38 }
 0x112   :  { %v176_v43 = vrot.slane %v175_v42, 1  ;;  %v184_v44 = vadd.f32 %v183_v41, %v182_v39 }
 0x114   :  { %v177_v45 = vadd.f32 %v176_v43, %v175_v42 }
 0x116   :  { %718 = vrcp.f32 %v177_v45 }
 0x117   :  { %720 = vrcp.f32 %v184_v44 }
 0x123   :  { %v719_v46 = vpop.eup %718 }
 0x124   :  { %v187_v47 = vmul.f32 %v719_v46, %v717_v32  ;;  %v721_v48 = vpop.eup %720 }
 0x125   :  { %v188_v49 = vmul.f32 %v721_v48, %v715_v30 }
 0x126   :  { %189 = vxpose.xlu0.b32.start.end [1/1] (short) (narrow) %v187_v47, 8 }
 0x12a   :  { %295 = vxpose.xlu0.b32.start.end [1/1] (short) (narrow) %v188_v49, 8 }
 0x1a2   :  { %v205_v50 = vpop.trf.xlu0 }
 0x1a3   :  { %660 = vmatmul.mubr.msk.f32.vlgmr.msra.gmra.mxu1 %vm221_vm3, %v205_v50 }
 0x1a4   :  { %663 = vmatpush3.msra.mxu1 %v864_v5  ;;  %664 = vmatprep.mubr.msk.f32.mxu1 %vm795_vm1, %v794_v6 }
 0x1a5   :  { %667 = vmatprep.subr.mxu1 %v794_v6 }
 0x1a6   :  { %v311_v51 = vpop.trf.xlu0 }
 0x1a7   :  { %665 = vmatmul.mubr.msk.f32.vlgmr.msra.gmra.mxu1 %vm221_vm3, %v311_v51 }
 0x1a8   :  { %683 = vmatprep.mubr.msk.f32.mxu1 %vm795_vm1, %v794_v6  ;;  %668 = vmatpush3.msra.mxu1 %v421_v52 }
 0x1a9   :  { %669 = vmatprep.subr.mxu1 %v794_v6 }
 0x1aa   :  { %670 = vmatpush3.msra.mxu1 %v420_v53 }
 0x1ab   :  { %671 = vmatprep.subr.mxu1 %v794_v6 }
 0x1ac   :  { %672 = vmatpush3.msra.mxu1 %v419_v54 }
 0x1ad   :  { %673 = vmatprep.subr.mxu1 %v794_v6 }
 0x1ae   :  { %674 = vmatpush3.msra.mxu1 %v418_v55 }
 0x1af   :  { %675 = vmatprep.subr.mxu1 %v794_v6 }
 0x1b0   :  { %676 = vmatpush3.msra.mxu1 %v417_v56 }
 0x1b1   :  { %677 = vmatprep.subr.mxu1 %v794_v6 }
 0x1b2   :  { %678 = vmatpush3.msra.mxu1 %v416_v57 }
 0x1b3   :  { %679 = vmatprep.subr.mxu1 %v794_v6 }
 0x1b4   :  { %680 = vmatpush3.msra.mxu1 %v415_v58 }
 0x1b5   :  { %681 = vmatprep.subr.mxu1 %v794_v6 }
 0x1b6   :  { %682 = vmatpush3.msra.mxu1 %v414_v62 }
 0x263   :  { %v291_v1 = vpop.f32.mrf.mxu1 }
 0x265   :  { %v661_v2 = vpop.f32.mrf.mxu1 }
 0x267   :  { %v396_v4 = vpop.f32.mrf.mxu1 }
 0x268   :  { %v400_v5 = vcombine.low %v291_v1, %v396_v4 }
 0x269   :  { %v666_v7 = vpop.f32.mrf.mxu1 }
 0x26a   :  { %v407_v8 = vrot.slane %v400_v5, %v406_v3 }
 0x26c   :  { %v408_v9 = vcombine.high %v407_v8, %v794_v6 }
 0x26e   :  { %410 = vrot.lane.b32.xlu1 %v408_v9, %s797_s2 }
 0x2e0   :  { %v411_v10 = vpop.permute.xlu1 %410 }
 0x2e1   :  { %v413_v11 = vsel %vm68_vm0, %v407_v8, %v411_v10 }
 0x2e2   :  { %684 = vmatmul.mubr.msk.f32.vlgmr.msra.gmra.mxu1 %vm429_vm4, %v413_v11 }
 0x3a2   :  { %v499_v21 = vpop.f32.mrf.mxu1 }
 0x3a3   :  { %v500_v22 = vadd.f32 %v614_v20, %v499_v21 }
 0x3a4   :  { %v685_v23 = vpop.f32.mrf.mxu1 }
 0x3a5   :  { %722 = vtanh.f32 %v500_v22 }
 0x3b2   :  { %v723_v24 = vpop.eup %722 }
 0x3b3   :  { %703 = vmatmul.mubr.msk.f32.vlgmr.msra.gmra.mxu0 %vm429_vm4, %v723_v24 }
 0x473   :  { %v588_v26 = vpop.f32.mrf.mxu0 }
 0x474   :  { %v589_v6 = vadd.f32 %v616_v25, %v588_v26 }
 0x475   :  { %v704_v27 = vpop.f32.mrf.mxu0 }
 0x476   :  { %592 = vst [vmem:[#allocation7] sm:$0x3] %v589_v6 }
 0x477   :  { %775 = shalt.err (!%p772_p0)
}
 0x478   :  { %602 = dma.vmem_to_hbm [thread:$0]  %s600_s28, 32, %s922_s7, [#allocation4]  }
 0x479   :  { %788 = dma.done.wait [#allocation4], 32  }
 0x47a   :  { %789 = vsyncadd [#allocation4], 4294967264 }
 0x47b   :  { %606 = vsyncpa [#allocation3], 1 }
 0x47c   :  { %607 = vsyncpa [#allocation6], 1 }
 0x47d   :  { %608 = vsyncpa [#allocation4], 1 }

</bundles_post_ra>
